<compile_context>
chip_gen: v5e
topology: v5e:2x2
jax: 0.10.0
libtpu: 0.0.40
codegen_flags: <defaults>
</compile_context>

<pallas_src>
import numpy as np
import jax
import jax.numpy as jnp
from jax.experimental import pallas as pl
from jax.experimental.pallas import tpu as pltpu


def _attn_kernel(p_ref, o_ref, e_ref, wg_ref, bg_ref, out_ref):
    p = p_ref[...]                                   # [BB, L, C] position fmap block
    o = o_ref[...]                                   # [BB, L, C] origin fmap block
    bb = p.shape[0]
    t, c = e_ref.shape

    # Broadcast E along the batch-block dim so both batched matmuls contract their
    # last axes (no transpose / relayout anywhere in the kernel).
    e_b = jnp.broadcast_to(e_ref[...], (bb, t, c))   # [BB, T, C]

    # scores[b, t, l] = sum_c E[t, c] * P[b, l, c]   (MXU, f32 accumulation)
    s = jnp.einsum('btc,blc->btl', e_b, p,
                   preferred_element_type=jnp.float32)        # [BB, T, L]

    # numerically-stable softmax over L (lane axis); normalization deferred.
    m = jnp.max(s, axis=-1, keepdims=True)
    ex = jnp.exp(s - m)                                        # [BB, T, L] f32
    denom = jnp.sum(ex, axis=-1, keepdims=True)                # [BB, T, 1] f32

    # unnormalized context, then EUP reciprocal scale (no [T, L] divide on the VPU).
    ctx = jnp.einsum('btl,blc->btc', ex.astype(o.dtype), o,
                     preferred_element_type=jnp.float32)       # [BB, T, C] f32
    ctx = ctx * pl.reciprocal(denom, approx=True)

    # generator: merge (BB, T) -> one lane-dense MXU matmul for the whole block.
    ctx2 = ctx.reshape(bb * t, c).astype(wg_ref.dtype)
    z = jnp.dot(ctx2, wg_ref[...], preferred_element_type=jnp.float32)
    z = z + bg_ref[...]                                        # [BB*T, Npad] + [1, Npad]
    out_ref[...] = z.reshape(bb, t, out_ref.shape[-1]).astype(out_ref.dtype)


def attn_module_forward(position_fmap, origin_fmap, emb_weight, gen_weight, gen_bias,
                        *, compute_dtype=None, block_batch=None):
    """position_fmap / origin_fmap: [B, ..., C] feature maps (spatial flattened to L).
    emb_weight: [T, C]. gen_weight: [N, C] (PyTorch out,in). gen_bias: [N].
    compute_dtype: optional streaming/matmul dtype (e.g. jnp.bfloat16 on v6e/v7x).
    Returns g_prime: [B, T, N]."""
    B = position_fmap.shape[0]
    C = position_fmap.shape[-1]
    L = int(np.prod(position_fmap.shape[1:-1]))
    T = emb_weight.shape[0]
    N = gen_weight.shape[0]
    out_dtype = position_fmap.dtype

    cd = compute_dtype if compute_dtype is not None else position_fmap.dtype
    p = position_fmap.reshape(B, L, C).astype(cd)
    o = origin_fmap.reshape(B, L, C).astype(cd)
    e = emb_weight.astype(cd)

    # Lane-dense output: zero-pad the class dim to a multiple of 128.
    # (In a real module this weight prep is hoisted to init.)
    N_pad = ((N + 127) // 128) * 128
    wg = jnp.zeros((C, N_pad), cd).at[:, :N].set(jnp.transpose(gen_weight).astype(cd))
    bg = jnp.zeros((1, N_pad), jnp.float32).at[:, :N].set(
        gen_bias.astype(jnp.float32).reshape(1, N))

    # Choose how many batch elements each grid step processes: as big as a modest
    # VMEM budget allows (double-buffered P+O streams), but keep >= 2 grid steps so
    # v7x's two TensorCores both get work (harmless on v5e/v6e).
    itemsize = jnp.dtype(cd).itemsize
    if block_batch is None:
        per_elem = 2 * L * C * itemsize                    # P + O bytes per batch element
        budget = 8 << 20                                   # per-buffer budget (v7x-safe)
        bb = max(1, budget // max(per_elem, 1))
        bb = int(min(bb, max(1, B // 2)))
    else:
        bb = int(block_batch)
    bb = max(1, min(bb, B))

    grid_b = pl.cdiv(B, bb)
    B_pad = grid_b * bb
    if B_pad != B:                                         # zero-pad batch to a whole grid
        p = jnp.pad(p, ((0, B_pad - B), (0, 0), (0, 0)))
        o = jnp.pad(o, ((0, B_pad - B), (0, 0), (0, 0)))

    # VMEM budget: double-buffered input streams + output block + resident weights.
    in_bytes = 2 * 2 * bb * L * C * itemsize
    out_bytes = 2 * bb * T * N_pad * jnp.dtype(out_dtype).itemsize
    res_bytes = 2 * ((T * C + C * N_pad) * itemsize + N_pad * 4)
    vmem_limit = int(min(max(in_bytes + out_bytes + res_bytes + (8 << 20), 32 << 20),
                         64 << 20))

    cost = pl.CostEstimate(
        flops=int(B_pad) * (4 * T * L * C + 2 * T * C * N_pad),
        transcendentals=int(B_pad) * T * L,
        bytes_accessed=int(2 * B_pad * L * C * itemsize
                           + (T * C + C * N_pad) * itemsize + N_pad * 4
                           + B_pad * T * N_pad * jnp.dtype(out_dtype).itemsize),
    )

    out = pl.pallas_call(
        _attn_kernel,
        out_shape=jax.ShapeDtypeStruct((B_pad, T, N_pad), out_dtype),
        grid_spec=pltpu.PrefetchScalarGridSpec(
            num_scalar_prefetch=0,
            grid=(grid_b,),
            in_specs=[
                pl.BlockSpec((bb, L, C), lambda b: (b, 0, 0)),   # position fmap block
                pl.BlockSpec((bb, L, C), lambda b: (b, 0, 0)),   # origin fmap block
                pl.BlockSpec((T, C), lambda b: (0, 0)),          # embedding table (resident)
                pl.BlockSpec((C, N_pad), lambda b: (0, 0)),      # generator weight (resident)
                pl.BlockSpec((1, N_pad), lambda b: (0, 0)),      # generator bias (resident)
            ],
            out_specs=pl.BlockSpec((bb, T, N_pad), lambda b: (b, 0, 0)),
        ),
        compiler_params=pltpu.CompilerParams(
            dimension_semantics=("parallel",),
            vmem_limit_bytes=vmem_limit),
        cost_estimate=cost,
    )(p, o, e, wg, bg)

    return out[:B, :, :N]


def _reference(position_fmap, origin_fmap, emb_weight, gen_weight, gen_bias):
    B, C = position_fmap.shape[0], position_fmap.shape[-1]
    p = position_fmap.reshape(B, -1, C)
    o = origin_fmap.reshape(B, -1, C)
    hi = jax.lax.Precision.HIGHEST
    s = jnp.einsum('blc,tc->blt', p, emb_weight, precision=hi)
    a = jax.nn.softmax(s, axis=1)                                  # softmax over L (torch dim=1)
    ctx = jnp.einsum('blt,blc->btc', a, o, precision=hi)
    return jnp.einsum('btc,nc->btn', ctx, gen_weight, precision=hi) + gen_bias


if __name__ == "__main__":
    batch, H, W = 2, 8, 8
    output_channel = 32            # C (hidden size of the feature maps / embedding dim)
    batch_max_length = 7           # -> T = 8 decode steps
    num_steps = batch_max_length + 1
    num_classes = 38               # N

    key = jax.random.PRNGKey(0)
    k_p, k_o, k_e, k_w, k_b = jax.random.split(key, 5)

    position_fmap = jax.random.normal(k_p, (batch, H, W, output_channel), jnp.float32)
    origin_fmap = jax.random.normal(k_o, (batch, H, W, output_channel), jnp.float32)

    # nn.Embedding default init: N(0, 1)
    emb_weight = jax.random.normal(k_e, (num_steps, output_channel), jnp.float32)
    # nn.Linear default init: U(-1/sqrt(fan_in), 1/sqrt(fan_in))
    bound = 1.0 / np.sqrt(output_channel)
    gen_weight = jax.random.uniform(k_w, (num_classes, output_channel), jnp.float32, -bound, bound)
    gen_bias = jax.random.uniform(k_b, (num_classes,), jnp.float32, -bound, bound)

    # f32 path (tight tolerance; approx reciprocal is the only non-exact step).
    out = attn_module_forward(position_fmap, origin_fmap, emb_weight, gen_weight, gen_bias)
    out = jax.block_until_ready(out)
    ref = jax.block_until_ready(_reference(position_fmap, origin_fmap,
                                           emb_weight, gen_weight, gen_bias))
    assert out.shape == (batch, num_steps, num_classes)
    np.testing.assert_allclose(np.asarray(out), np.asarray(ref), rtol=2e-3, atol=2e-3)

    # bf16-streaming path (v6e/v7x optimization); compare against a reference fed the
    # same bf16-rounded operands, with a looser tolerance for the bf16 intermediates.
    out_bf = attn_module_forward(position_fmap, origin_fmap, emb_weight, gen_weight,
                                 gen_bias, compute_dtype=jnp.bfloat16)
    out_bf = jax.block_until_ready(out_bf)
    rd = lambda x: x.astype(jnp.bfloat16).astype(jnp.float32)
    ref_bf = jax.block_until_ready(_reference(rd(position_fmap), rd(origin_fmap),
                                              rd(emb_weight), rd(gen_weight), gen_bias))
    np.testing.assert_allclose(np.asarray(out_bf), np.asarray(ref_bf), rtol=5e-2, atol=5e-2)

    print("KERNEL_OK")
</pallas_src>

<mosaic_0001>
module attributes {stable_mosaic.version = 11 : i64} {
  func.func @_attn_kernel(%arg0: i32, %arg1: memref<1x64x32xf32, #tpu.memory_space<vmem>>, %arg2: memref<1x64x32xf32, #tpu.memory_space<vmem>>, %arg3: memref<8x32xf32, #tpu.memory_space<vmem>>, %arg4: memref<32x128xf32, #tpu.memory_space<vmem>>, %arg5: memref<1x128xf32, #tpu.memory_space<vmem>>, %arg6: memref<1x8x128xf32, #tpu.memory_space<vmem>>) attributes {dimension_semantics = [#tpu.dimension_semantics<parallel>], iteration_bounds = array<i64: 2>, scalar_prefetch = 0 : i64, scratch_operands = 0 : i64, tpu.core_type = #tpu.core_type<tc>, window_params = [{transform_indices = @transform_0, window_bounds = array<i64: 1, 64, 32>}, {transform_indices = @transform_1, window_bounds = array<i64: 1, 64, 32>}, {pipeline_mode = #tpu.pipeline_mode<synchronous>, transform_indices = @transform_2, window_bounds = array<i64: 8, 32>}, {pipeline_mode = #tpu.pipeline_mode<synchronous>, transform_indices = @transform_3, window_bounds = array<i64: 32, 128>}, {pipeline_mode = #tpu.pipeline_mode<synchronous>, transform_indices = @transform_4, window_bounds = array<i64: 1, 128>}, {transform_indices = @transform_5, window_bounds = array<i64: 1, 8, 128>}]} {
    %c0 = arith.constant 0 : index
    %c0_0 = arith.constant 0 : index
    %c0_1 = arith.constant 0 : index
    %0 = vector.load %arg1[%c0, %c0_0, %c0_1] : memref<1x64x32xf32, #tpu.memory_space<vmem>>, vector<1x64x32xf32>
    %c0_2 = arith.constant 0 : index
    %c0_3 = arith.constant 0 : index
    %c0_4 = arith.constant 0 : index
    %1 = vector.load %arg2[%c0_2, %c0_3, %c0_4] : memref<1x64x32xf32, #tpu.memory_space<vmem>>, vector<1x64x32xf32>
    %c0_5 = arith.constant 0 : index
    %c0_6 = arith.constant 0 : index
    %2 = vector.load %arg3[%c0_5, %c0_6] : memref<8x32xf32, #tpu.memory_space<vmem>>, vector<8x32xf32>
    %3 = vector.shape_cast %2 : vector<8x32xf32> to vector<1x8x32xf32>
    "tpu.trace_start"() <{level = 10 : i32, message = "btc,blc->btl"}> : () -> ()
    %cst = arith.constant dense<0.000000e+00> : vector<1x8x64xf32>
    %4 = tpu.matmul %3, %0, %cst {dimension_numbers = #tpu.dot_dimension_numbers<[2], [2], [1], [1], [0, 0, 0, 1, 1, 1], [0], [0]>} : vector<1x8x32xf32>, vector<1x64x32xf32>, vector<1x8x64xf32> -> vector<1x8x64xf32>
    "tpu.trace_stop"() : () -> ()
    %cst_7 = arith.constant dense<0xFF800000> : vector<1x8xf32>
    %5 = vector.multi_reduction <maximumf>, %4, %cst_7 [2] : vector<1x8x64xf32> to vector<1x8xf32>
    %6 = vector.shape_cast %5 : vector<1x8xf32> to vector<1x8x1xf32>
    %7 = vector.broadcast %6 : vector<1x8x1xf32> to vector<1x8x64xf32>
    %8 = arith.subf %4, %7 : vector<1x8x64xf32>
    %9 = math.exp %8 : vector<1x8x64xf32>
    %cst_8 = arith.constant dense<0.000000e+00> : vector<1x8xf32>
    %10 = vector.multi_reduction <add>, %9, %cst_8 [2] : vector<1x8x64xf32> to vector<1x8xf32>
    %11 = vector.shape_cast %10 : vector<1x8xf32> to vector<1x8x1xf32>
    "tpu.trace_start"() <{level = 10 : i32, message = "btl,blc->btc"}> : () -> ()
    %cst_9 = arith.constant dense<0.000000e+00> : vector<1x8x32xf32>
    %12 = tpu.matmul %9, %1, %cst_9 {dimension_numbers = #tpu.dot_dimension_numbers<[2], [1], [1], [2], [0, 0, 0, 1, 1, 2], [0], [0]>} : vector<1x8x64xf32>, vector<1x64x32xf32>, vector<1x8x32xf32> -> vector<1x8x32xf32>
    "tpu.trace_stop"() : () -> ()
    %13 = tpu.reciprocal %11 {approx = true} : vector<1x8x1xf32> -> vector<1x8x1xf32>
    %14 = vector.broadcast %13 : vector<1x8x1xf32> to vector<1x8x32xf32>
    %15 = arith.mulf %12, %14 : vector<1x8x32xf32>
    %16 = vector.shape_cast %15 : vector<1x8x32xf32> to vector<8x32xf32>
    %c0_10 = arith.constant 0 : index
    %c0_11 = arith.constant 0 : index
    %17 = vector.load %arg4[%c0_10, %c0_11] : memref<32x128xf32, #tpu.memory_space<vmem>>, vector<32x128xf32>
    %cst_12 = arith.constant dense<0.000000e+00> : vector<8x128xf32>
    %18 = tpu.matmul %16, %17, %cst_12 {dimension_numbers = #tpu.dot_dimension_numbers<[1], [0], [0], [1], [0, 0, 1, 1], [], []>} : vector<8x32xf32>, vector<32x128xf32>, vector<8x128xf32> -> vector<8x128xf32>
    %c0_13 = arith.constant 0 : index
    %c0_14 = arith.constant 0 : index
    %19 = vector.load %arg5[%c0_13, %c0_14] : memref<1x128xf32, #tpu.memory_space<vmem>>, vector<1x128xf32>
    %20 = vector.broadcast %19 : vector<1x128xf32> to vector<8x128xf32>
    %21 = arith.addf %18, %20 : vector<8x128xf32>
    %22 = vector.shape_cast %21 : vector<8x128xf32> to vector<1x8x128xf32>
    %c0_15 = arith.constant 0 : index
    %c0_16 = arith.constant 0 : index
    %c0_17 = arith.constant 0 : index
    %23 = vector.load %arg6[%c0_15, %c0_16, %c0_17] : memref<1x8x128xf32, #tpu.memory_space<vmem>>, vector<1x8x128xf32>
    tpu.vector_store %arg6[%c0_15, %c0_16, %c0_17], %22 {strides = array<i32>} : memref<1x8x128xf32, #tpu.memory_space<vmem>>, vector<1x8x128xf32>,
    return
  }
  func.func @transform_0(%arg0: i32) -> (i32, i32, i32) {
    %c0_i32 = arith.constant 0 : i32
    %c0_i32_0 = arith.constant 0 : i32
    %c0_i32_1 = arith.constant 0 : i32
    return %arg0, %c0_i32, %c0_i32_0 : i32, i32, i32
  }
  func.func @transform_1(%arg0: i32) -> (i32, i32, i32) {
    %c0_i32 = arith.constant 0 : i32
    %c0_i32_0 = arith.constant 0 : i32
    %c0_i32_1 = arith.constant 0 : i32
    return %arg0, %c0_i32, %c0_i32_0 : i32, i32, i32
  }
  func.func @transform_2(%arg0: i32) -> (i32, i32) {
    %c0_i32 = arith.constant 0 : i32
    %c0_i32_0 = arith.constant 0 : i32
    %c0_i32_1 = arith.constant 0 : i32
    return %c0_i32, %c0_i32_0 : i32, i32
  }
  func.func @transform_3(%arg0: i32) -> (i32, i32) {
    %c0_i32 = arith.constant 0 : i32
    %c0_i32_0 = arith.constant 0 : i32
    %c0_i32_1 = arith.constant 0 : i32
    return %c0_i32, %c0_i32_0 : i32, i32
  }
  func.func @transform_4(%arg0: i32) -> (i32, i32) {
    %c0_i32 = arith.constant 0 : i32
    %c0_i32_0 = arith.constant 0 : i32
    %c0_i32_1 = arith.constant 0 : i32
    return %c0_i32, %c0_i32_0 : i32, i32
  }
  func.func @transform_5(%arg0: i32) -> (i32, i32, i32) {
    %c0_i32 = arith.constant 0 : i32
    %c0_i32_0 = arith.constant 0 : i32
    %c0_i32_1 = arith.constant 0 : i32
    return %arg0, %c0_i32, %c0_i32_0 : i32, i32, i32
  }
}

</mosaic_0001>

<bundles_post_ra>
// kernel: tpu_custom_call.1
= control target key start
LH: loop header
LB: loop body
LE: loop exit
PB: predicated region body
PF: predicated region fallthrough
CT: control target
= control target key end

     0   :  { %10 = vsyncpa [#allocation3], 0  ;;  %s745_s0 = inlined_call_operand.vmem [shape: f32[2,64,32], index: 0, kind: input, shape index: {}]   ;;  %s746_s1 = inlined_call_operand.vmem [shape: f32[2,64,32], index: 1, kind: input, shape index: {}]   ;;  %s747_s2 = inlined_call_operand.vmem [shape: f32[8,32], index: 2, kind: input, shape index: {}]   ;;  %s748_s3 = inlined_call_operand.vmem [shape: f32[32,128], index: 3, kind: input, shape index: {}]   ;;  %s749_s4 = inlined_call_operand.vmem [shape: f32[1,128], index: 4, kind: input, shape index: {}]   ;;  %s750_s5 = inlined_call_operand.hbm [shape: f32[2,8,128], index: 5, kind: output, shape index: {}]  }
   0x1   :  { %12 = vsyncpa [#allocation3 + $0x1], 0  ;;  %s626_s18 = smov 0   ;;  %s628_s19 = smov 0  }
   0x2   :  { %s630_s20 = smov 0   ;;  %s632_s21 = smov 0  }
   0x3 LB: > { %s647_s22 = sadd.s32 4294967295, %s594_s21   ;;  %s462_s23 = sadd.s32 4294967294, %s594_s21   ;;  %s594_s21 = sphi %s632_s21, %s756_s21   ;;  %s590_s20 = sphi %s630_s20, %s755_s20   ;;  %s586_s19 = sphi %s628_s19, %s754_s19   ;;  %s582_s18 = sphi %s626_s18, %s753_s18  }
   0x4   : > { %s651_s24 = sadd.s32 1, %s594_s21   ;;  %s140_s25 = sadd.s32 1, %s590_s20 }
   0x5   : > { %s137_s26 = ssub.s32 %s594_s21, %s651_s24  ;;  %p150_p0 = scmp.ne.s32.totalorder %s590_s20, %s586_s19 }
   0x6   : > { %p138_p1 = scmp.eq.s32.totalorder %s137_s26, 0  ;;  %p151_p2 = scmp.eq.s32.totalorder %s647_s22, 1 }
   0x7   : > { %p156_p3 = scmp.ne.s32.totalorder %s586_s19, %s582_s18  ;;  %p157_p4 = scmp.eq.s32.totalorder %s462_s23, 1 }
   0x8   : > { %s662_s27 = scalar_select %p138_p1, %s590_s20, %s140_s25  }
   0x9   : > { %p664_p5 = por %p151_p2, %p150_p0  ;;  %p668_p6 = por %p157_p4, %p156_p3 }
   0xa   : > { %p465_p7 = scmp.ge.s32.totalorder %s594_s21, 1  ;;  %p200_p8 = scmp.lt.s32.totalorder %s594_s21, 3 }
   0xc   : > { %p201_p9 = pnand %p465_p7, %p200_p8 }
   0xd   : > { %p233_p10 = scmp.lt.s32.totalorder (!%p201_p9), %s647_s22, 1  ;;  %s230_s7 = sand.u32 (!%p201_p9), 1, %s586_s19  }
   0xe   : > { %204 = sbr.rel (%p201_p9) target bundleno = 574 (0x23e), region = 40  ;;  %s466_s8 = sshll.u32 (!%p201_p9), %s230_s7, 3 }
   0xf   : > { %s232_s15 = scalar_lea.vmem (!%p201_p9), [#allocation2], %s466_s8  ;;  %s376_s23 = scalar_lea.sflag (!%p201_p9), [#allocation3], %s230_s7 }
  0x10   : > { %s388_s16 = sshll.u32 (!%p201_p9), %s232_s15, 4  ;;  %s389_s16 = int_to_ptr.vmem [resolvable:$true] %s388_s16 }
  0x13   : > { %s234_s30 = scalar_select %p233_p10, %s647_s22, 1  ;;  %vm260_vm0 = vcmask 261120   ;;  %v259_v8 = vld [vmem:[%s747_s2] sm:$0xff]  ;;  %vm308_vm1 = vcmask 523264   ;;  %v346_v24 = vld [vmem:[%s748_s3 + $0x18] sm:$0xff]  ;;  %v345_v25 = vld [vmem:[%s748_s3 + $0x10] sm:$0xff] }
  0x14   : > { %366 = vmatpush.msra.mxu2 %v346_v24  ;;  %v344_v26 = vld [vmem:[%s748_s3 + $0x8] sm:$0xff]  ;;  %v343_v27 = vld [vmem:[%s748_s3] sm:$0xff] }
  0x15   : > { %s486_s6 = sshll.u32 %s234_s30, 6  ;;  %v527_v32 = vld [vmem:[%s749_s4] ss:$0 sm:$0xff] }
  0x16   : > { %s237_s9 = scalar_lea.vmem %s745_s0, %s486_s6  ;;  %s242_s14 = scalar_lea.vmem %s746_s1, %s486_s6  ;;  %367 = vmatpush.msra.mxu2 %v345_v25 }
  0x17   : > { %v250_v0 = vld [vmem:[%s237_s9 + $0x38] sm:$0xff]  ;;  %v249_v1 = vld [vmem:[%s237_s9 + $0x30] sm:$0xff]  ;;  %v248_v2 = vld [vmem:[%s237_s9 + $0x28] sm:$0xff]  ;;  %s552_s6 = scalar_lea.hbm %s750_s5, 16 }
  0x18   : > { %471 = vmatpush.xpose.msk.msra.mxu0 %vm260_vm0, %v250_v0  ;;  %v247_v3 = vld [vmem:[%s237_s9 + $0x20] sm:$0xff]  ;;  %v246_v4 = vld [vmem:[%s237_s9 + $0x18] sm:$0xff]  ;;  %v245_v5 = vld [vmem:[%s237_s9 + $0x10] sm:$0xff]  ;;  %368 = vmatpush.msra.mxu2 %v344_v26 }
  0x19   : > { %v244_v6 = vld [vmem:[%s237_s9 + $0x8] sm:$0xff]  ;;  %v243_v7 = vld [vmem:[%s237_s9] sm:$0xff]  ;;  %v258_v9 = vld [vmem:[%s242_s14 + $0x38] sm:$0xff]  ;;  %s483_s9 = sshll.u32 %s647_s22, 3 }
  0x1a   : > { %v257_v10 = vld [vmem:[%s242_s14 + $0x30] sm:$0xff]  ;;  %329 = vmatpush.msra.mxu1 %v258_v9  ;;  %v256_v13 = vld [vmem:[%s242_s14 + $0x28] sm:$0xff]  ;;  %v255_v14 = vld [vmem:[%s242_s14 + $0x20] sm:$0xff]  ;;  %369 = vmatpush.msra.mxu2 %v343_v27  ;;  %s386_s12 = scalar_lea.hbm %s750_s5, %s483_s9 }
  0x1b   : > { %v254_v15 = vld [vmem:[%s242_s14 + $0x18] sm:$0xff]  ;;  %v253_v16 = vld [vmem:[%s242_s14 + $0x10] sm:$0xff]  ;;  %v252_v17 = vld [vmem:[%s242_s14 + $0x8] sm:$0xff]  ;;  %s390_s17 = sshll.u32 %s386_s12, 4  ;;  %s391_s17 = int_to_ptr.hbm [resolvable:$true] %s390_s17 }
  0x1c   : > { %472 = vmatpush.xpose.msk.msra.mxu0 %vm260_vm0, %v249_v1  ;;  %330 = vmatpush.msra.mxu1 %v257_v10  ;;  %v251_v18 = vld [vmem:[%s242_s14] sm:$0xff]  ;;  %s546_s25 = sshra.s32 %s391_s17, 4  ;;  %s547_s25 = int_to_ptr.hbm [resolvable:$true] %s546_s25 }
  0x1d   : > { %s548_s22 = scalar_lea.hbm %s547_s25, 8  ;;  %p553_p0 = scmp.lt.s32.totalorder %s547_s25, %s750_s5 }
  0x1e   : > { %331 = vmatpush.msra.mxu1 %v256_v13  ;;  %p549_p11 = scmp.ne.s32.totalorder %s547_s25, %s548_s22  ;;  %p554_p1 = scmp.lt.s32.totalorder %s552_s6, %s548_s22 }
  0x20   : > { %473 = vmatpush.xpose.msk.msra.mxu0 %vm260_vm0, %v248_v2  ;;  %332 = vmatpush.msra.mxu1 %v255_v14  ;;  %p550_p12 = pnand %p549_p11, %p664_p5  ;;  %p555_p2 = por %p554_p1, %p553_p0 }
  0x22   : > { %333 = vmatpush.msra.mxu1 %v254_v15  ;;  %p551_p13 = pneg %p550_p12 }
  0x24   : > { %474 = vmatpush.xpose.msk.msra.mxu0 %vm260_vm0, %v247_v3  ;;  %334 = vmatpush.msra.mxu1 %v253_v16  ;;  %p556_p3 = pnand %p555_p2, %p551_p13 }
  0x26   : > { %335 = vmatpush.msra.mxu1 %v252_v17 }
  0x28   : > { %475 = vmatpush.xpose.msk.msra.mxu0 %vm260_vm0, %v246_v4  ;;  %336 = vmatpush.msra.mxu1 %v251_v18 }
  0x2c   : > { %476 = vmatpush.xpose.msk.msra.mxu0 %vm260_vm0, %v245_v5 }
  0x30   : > { %477 = vmatpush.xpose.msk.msra.mxu0 %vm260_vm0, %v244_v6 }
  0x34   : > { %478 = vmatpush.xpose.msk.msra.mxu0 %vm260_vm0, %v243_v7 }
  0x37   : > { %479 = vmatmul.msk.f32.vlgmr.msra.gmra.mxu0 %vm260_vm0, %v259_v8 }
  0xb4   : > { %v305_v11 = vpop.f32.mrf.mxu0 }
  0xb5   : > { %v309_v12 = vsel %vm308_vm1, %v305_v11, -inf }
  0xb6   : > { %310 = vmax.xlane.f32.xlu0 %v309_v12 }
 0x129   : > { %v311_v19 = vpop.xlane.xlu0 %310 }
 0x12a   : > { %v312_v20 = vsub.f32 %v305_v11, %v311_v19 }
 0x12c   : > { %v313_v21 = vmul.f32 1.442695, %v312_v20 }
 0x12e   : > { %528 = vpow2.f32 %v313_v21 }
 0x134   : > { %v529_v22 = vpop.eup %528 }
 0x135   : > { %480 = vmatmul.msk.f32.vlgmr.msra.gmra.mxu1 %vm308_vm1, %v529_v22  ;;  %v315_v23 = vsel %vm308_vm1, %v529_v22, 0.0 }
 0x136   : > { %316 = vadd.xlane.f32.xlu0 %v315_v23 }
 0x1a9   : > { %v317_v28 = vpop.xlane.xlu0 %316 }
 0x1aa   : > { %530 = vrcp.f32 %v317_v28 }
 0x1b0   : > { %v531_v29 = vpop.eup %530 }
 0x1b2   : > { %v338_v30 = vpop.f32.mrf.mxu1 }
 0x1b3   : > { %v342_v31 = vmul.f32 %v531_v29, %v338_v30 }
 0x1b5   : > { %481 = vmatmul.msk.f32.vlgmr.msra.gmra.mxu2 %vm260_vm0, %v342_v31 }
 0x238   : > { %v371_v33 = vpop.f32.mrf.mxu2 }
 0x239   : > { %v372_v34 = vadd.f32 %v527_v32, %v371_v33 }
 0x23b   : > { %374 = vst [vmem:[%s232_s15] sm:$0xff] %v372_v34 }
 0x23c   : > { %559 = shalt.err (!%p556_p3)
}
 0x23d   : > { %488 = dma.vmem_to_hbm [thread:$0]  (%p664_p5), %s389_s16, 128, %s391_s17, %s376_s23  }
 0x23e PF: > { %p494_p4 = scmp.ge.s32.totalorder %s594_s21, 2  ;;  %s402_s7 = sand.u32 1, %s582_s18  }
 0x23f   : > { %s403_s10 = scalar_lea.sflag [#allocation3], %s402_s7 }
 0x240   : > { %p491_p7 = pnand %p494_p4, %p668_p6 }
 0x242   : > { %p492_p8 = pneg %p491_p7 }
 0x244   : > { %577 = dma.done.wait (%p492_p8), %s403_s10, 128  }
 0x245   : > { %579 = vsyncadd (%p492_p8), %s403_s10, 4294967168  ;;  %p15_p9 = scmp.ge.s32.totalorder %s651_s24, 4   ;;  %s753_s18 = smov %s586_s19 }
 0x246   : > { %s754_s19 = smov %s590_s20  ;;  %s755_s20 = smov %s662_s27 }
 0x247   : > { %s756_s21 = smov %s651_s24  ;;  %17 = sbr.rel (!%p15_p9) target bundleno = 3 (0x3), region = 78 }
 0x24c   :  { %409 = vsyncpa [#allocation3], 1 }
 0x24d   :  { %411 = vsyncpa [#allocation3 + $0x1], 1 }

</bundles_post_ra>
